<compile_context>
chip_gen: v6e
topology: v6e:2x2x1
jax: 0.10.0
libtpu: 0.0.40
codegen_flags: <defaults>
</compile_context>

<pallas_src>
import numpy as np
import jax
import jax.numpy as jnp
from jax import lax
from jax.experimental import pallas as pl
from jax.experimental.pallas import tpu as pltpu


PATCH = 32   # ViT-B/32 patch size (fixed by the module's model choice)
UP = 7       # nn.Upsample(scale_factor=7)


# ---------------------------------------------------------------------------
# Host-side exact operator construction (precomposed:  M = Bm @ A)
# ---------------------------------------------------------------------------
def _build_pool_patchmean_matrix(S, up=UP):
    """M (32, S) such that (M @ x @ M^T) / 49 is the mean over the 7x7 ViT
    patch grid of AvgPool2d(S//32)(Upsample(x7)(x)).

    A[o, p] = (1/k) * |{ i in [0,k) : (o*k + i) // up == p }| is the exact
    1-D resample operator (AvgPool o Upsample); Bm[o%32, o] = 1 sums the 7
    patches along one axis.  M = Bm @ A.  Entries are C/k with k a power of
    two and C <= 7k, so M is exact in bf16 for k <= 32 (stylegan_size<=1024).
    """
    k = S // PATCH
    O = (S * up) // k            # == 224 for any S that is a multiple of 32
    A = np.zeros((O, S), dtype=np.float64)
    for o in range(O):
        for i in range(k):
            A[o, (o * k + i) // up] += 1.0 / k
    M = np.zeros((PATCH, S), dtype=np.float64)
    for o in range(O):
        M[o % PATCH] += A[o]
    return M.astype(np.float32)


# ---------------------------------------------------------------------------
# Kernel A: fused Upsample(x7) + AvgPool2d(k) + mean over the 49 ViT patches
# ---------------------------------------------------------------------------
def resample_and_patch_mean(image_bf16, M, M_T):
    """image_bf16: [N, C, S, S] bf16 -> [N, C, 32, 32] f32 patch-mean of the
    224x224 resampled image, computed as (M @ x_c @ M^T) / 49 per plane."""
    N, C, S, _ = image_bf16.shape
    G = (S * UP) // (S // PATCH) // PATCH        # == 7
    inv_patches = 1.0 / float(G * G)             # 1/49, applied in f32

    def kernel(m_ref, mt_ref, x_ref, o_ref):
        xc = x_ref[0, 0]                                             # (S, S) bf16
        t = jnp.dot(xc, mt_ref[...],
                    preferred_element_type=jnp.float32)              # (S, 32)
        pm = jnp.dot(m_ref[...], t.astype(jnp.bfloat16),
                     preferred_element_type=jnp.float32)             # (32, 32)
        o_ref[0, 0] = pm * inv_patches

    return pl.pallas_call(
        kernel,
        out_shape=jax.ShapeDtypeStruct((N, C, PATCH, PATCH), jnp.float32),
        grid=(N, C),
        in_specs=[
            # M / M^T have constant index_maps -> DMA'd once, not per step.
            pl.BlockSpec((PATCH, S), lambda n, c: (0, 0)),
            pl.BlockSpec((S, PATCH), lambda n, c: (0, 0)),
            pl.BlockSpec((1, 1, S, S), lambda n, c: (n, c, 0, 0)),
        ],
        out_specs=pl.BlockSpec((1, 1, PATCH, PATCH),
                               lambda n, c: (n, c, 0, 0)),
        compiler_params=pltpu.CompilerParams(
            dimension_semantics=("parallel", "parallel")),  # megacore split
    )(M, M_T, image_bf16)


# ---------------------------------------------------------------------------
# Kernel B: fused CLIP tail — patch embed, projections, L2 norm, logits, loss
# ---------------------------------------------------------------------------
def clip_head(pm_flat, w_patch_bf16, w_img_proj, txt_mean, w_txt_proj,
              logit_scale):
    Ni, F = pm_flat.shape
    W = w_patch_bf16.shape[1]
    Nt, Wt = txt_mean.shape
    D = w_img_proj.shape[1]
    scale = float(logit_scale)   # trace-time constant: no scalar DMA needed

    def kernel(pm_ref, wp_ref, wip_ref, tx_ref, wtp_ref, o_ref):
        # image tower tail (patch mean already folded in upstream)
        tok = jnp.dot(pm_ref[...].astype(jnp.bfloat16), wp_ref[...],
                      preferred_element_type=jnp.float32)            # (Ni, W)
        img_f = jnp.dot(tok, wip_ref[...],
                        preferred_element_type=jnp.float32)          # (Ni, D)
        # text tower tail
        txt_f = jnp.dot(tx_ref[...], wtp_ref[...],
                        preferred_element_type=jnp.float32)          # (Nt, D)
        # L2 normalize (eps guard against zero-norm features)
        img_n = img_f * lax.rsqrt(jnp.sum(img_f * img_f, axis=-1,
                                          keepdims=True) + 1e-12)
        txt_n = txt_f * lax.rsqrt(jnp.sum(txt_f * txt_f, axis=-1,
                                          keepdims=True) + 1e-12)
        # logits = scale * img_n @ txt_n^T  (dot_general: no in-kernel transpose)
        logits = scale * lax.dot_general(
            img_n, txt_n, (((1,), (1,)), ((), ())),
            preferred_element_type=jnp.float32)                      # (Ni, Nt)
        o_ref[...] = 1.0 - logits / 100.0

    return pl.pallas_call(
        kernel,
        out_shape=jax.ShapeDtypeStruct((Ni, Nt), jnp.float32),
        grid=(1,),
        in_specs=[
            pl.BlockSpec((Ni, F), lambda i: (0, 0)),
            pl.BlockSpec((F, W), lambda i: (0, 0)),
            pl.BlockSpec((W, D), lambda i: (0, 0)),
            pl.BlockSpec((Nt, Wt), lambda i: (0, 0)),
            pl.BlockSpec((Wt, D), lambda i: (0, 0)),
        ],
        out_specs=pl.BlockSpec((Ni, Nt), lambda i: (0, 0)),
    )(pm_flat, w_patch_bf16, w_img_proj, txt_mean, w_txt_proj)


# ---------------------------------------------------------------------------
# CLIPLoss forward
# ---------------------------------------------------------------------------
def clip_loss_forward(image, text_tokens, params):
    N, C = image.shape[:2]

    # 1) fused upsample(x7)+avg_pool(S//32)+49-patch mean, bf16 image read.
    pm = resample_and_patch_mean(image.astype(jnp.bfloat16),
                                 params["M"], params["M_T"])  # (N, C, 32, 32)
    pm_flat = pm.reshape(N, C * PATCH * PATCH)                # (N, 3072)  glue

    # 2) text tower front: token-embedding gather + mean over sequence (glue)
    emb = jnp.take(params["tok_emb"], text_tokens, axis=0)    # (Nt, L, Wt)
    txt_mean = emb.mean(axis=1)                               # (Nt, Wt)

    # 3) fused tail: patch embed + projections + normalize + logits + 1-./100
    return clip_head(pm_flat, params["w_patch"], params["w_img_proj"],
                     txt_mean, params["w_txt_proj"], params["logit_scale"])


# ---------------------------------------------------------------------------
if __name__ == "__main__":
    # small shapes: batch=2, channels=3, stylegan_size=64, text batch=1, seq=8
    N, C, STYLEGAN_SIZE = 2, 3, 64
    WIDTH, WIDTH_T, EMBED_DIM, VOCAB, SEQ = 64, 32, 32, 64, 8

    key = jax.random.PRNGKey(0)
    k_img, k_txt, k_wp, k_wi, k_te, k_wt = jax.random.split(key, 6)

    image = jax.random.normal(k_img, (N, C, STYLEGAN_SIZE, STYLEGAN_SIZE),
                              dtype=jnp.float32)
    text_tokens = jax.random.randint(k_txt, (1, SEQ), 0, VOCAB)

    # Precomposed resample + patch-mean operator (exact in bf16 for S<=1024;
    # keep f32 and an f32 MXU path if stylegan_size > 1024).
    M_np = _build_pool_patchmean_matrix(STYLEGAN_SIZE)

    params = {
        "M": jnp.asarray(M_np, jnp.bfloat16),
        "M_T": jnp.asarray(M_np.T, jnp.bfloat16),
        # synthetic CLIP encoder weights
        "w_patch": (jax.random.normal(k_wp, (C * PATCH * PATCH, WIDTH),
                                      dtype=jnp.float32) * 0.02
                    ).astype(jnp.bfloat16),            # largest operand: bf16 DMA
        "w_img_proj": jax.random.normal(k_wi, (WIDTH, EMBED_DIM),
                                        dtype=jnp.float32) * 0.1,
        "tok_emb": jax.random.normal(k_te, (VOCAB, WIDTH_T),
                                     dtype=jnp.float32) * 0.02,
        "w_txt_proj": jax.random.normal(k_wt, (WIDTH_T, EMBED_DIM),
                                        dtype=jnp.float32) * 0.1,
        "logit_scale": 100.0,   # CLIP's exp(logit_scale) clamped max
    }

    sim = jax.block_until_ready(clip_loss_forward(image, text_tokens, params))
    assert sim.shape == (N, 1) and sim.dtype == jnp.float32
    assert bool(jnp.all(jnp.isfinite(sim)))
    print("KERNEL_OK")
</pallas_src>

<mosaic_0001>
module attributes {stable_mosaic.version = 11 : i64} {
  func.func @kernel(%arg0: i32, %arg1: i32, %arg2: memref<32x64xbf16, #tpu.memory_space<vmem>>, %arg3: memref<64x32xbf16, #tpu.memory_space<vmem>>, %arg4: memref<1x1x64x64xbf16, #tpu.memory_space<vmem>>, %arg5: memref<1x1x32x32xf32, #tpu.memory_space<vmem>>) attributes {dimension_semantics = [#tpu.dimension_semantics<parallel>, #tpu.dimension_semantics<parallel>], iteration_bounds = array<i64: 2, 3>, scalar_prefetch = 0 : i64, scratch_operands = 0 : i64, tpu.core_type = #tpu.core_type<tc>, window_params = [{pipeline_mode = #tpu.pipeline_mode<synchronous>, transform_indices = @transform_0, window_bounds = array<i64: 32, 64>}, {pipeline_mode = #tpu.pipeline_mode<synchronous>, transform_indices = @transform_1, window_bounds = array<i64: 64, 32>}, {transform_indices = @transform_2, window_bounds = array<i64: 1, 1, 64, 64>}, {transform_indices = @transform_3, window_bounds = array<i64: 1, 1, 32, 32>}]} {
    %c0 = arith.constant 0 : index
    %c0_0 = arith.constant 0 : index
    %c0_1 = arith.constant 0 : index
    %c0_2 = arith.constant 0 : index
    %0 = vector.load %arg4[%c0, %c0_0, %c0_1, %c0_2] : memref<1x1x64x64xbf16, #tpu.memory_space<vmem>>, vector<1x1x64x64xbf16>
    %1 = vector.shape_cast %0 : vector<1x1x64x64xbf16> to vector<64x64xbf16>
    %c0_3 = arith.constant 0 : index
    %c0_4 = arith.constant 0 : index
    %2 = vector.load %arg3[%c0_3, %c0_4] : memref<64x32xbf16, #tpu.memory_space<vmem>>, vector<64x32xbf16>
    %cst = arith.constant dense<0.000000e+00> : vector<64x32xf32>
    %3 = tpu.matmul %1, %2, %cst {dimension_numbers = #tpu.dot_dimension_numbers<[1], [0], [0], [1], [0, 0, 1, 1], [], []>} : vector<64x64xbf16>, vector<64x32xbf16>, vector<64x32xf32> -> vector<64x32xf32>
    %c0_5 = arith.constant 0 : index
    %c0_6 = arith.constant 0 : index
    %4 = vector.load %arg2[%c0_5, %c0_6] : memref<32x64xbf16, #tpu.memory_space<vmem>>, vector<32x64xbf16>
    %5 = arith.truncf %3 : vector<64x32xf32> to vector<64x32xbf16>
    %cst_7 = arith.constant dense<0.000000e+00> : vector<32x32xf32>
    %6 = tpu.matmul %4, %5, %cst_7 {dimension_numbers = #tpu.dot_dimension_numbers<[1], [0], [0], [1], [0, 0, 1, 1], [], []>} : vector<32x64xbf16>, vector<64x32xbf16>, vector<32x32xf32> -> vector<32x32xf32>
    %cst_8 = arith.constant 0.0204081628 : f32
    %7 = vector.broadcast %cst_8 : f32 to vector<32x32xf32>
    %8 = arith.mulf %6, %7 : vector<32x32xf32>
    %c0_9 = arith.constant 0 : index
    %c0_10 = arith.constant 0 : index
    %c0_11 = arith.constant 0 : index
    %c0_12 = arith.constant 0 : index
    %9 = vector.load %arg5[%c0_9, %c0_10, %c0_11, %c0_12] : memref<1x1x32x32xf32, #tpu.memory_space<vmem>>, vector<1x1x32x32xf32>
    %10 = vector.shape_cast %9 : vector<1x1x32x32xf32> to vector<32x32xf32>
    %11 = vector.shape_cast %8 : vector<32x32xf32> to vector<1x1x32x32xf32>
    tpu.vector_store %arg5[%c0_9, %c0_10, %c0_11, %c0_12], %11 {strides = array<i32>} : memref<1x1x32x32xf32, #tpu.memory_space<vmem>>, vector<1x1x32x32xf32>,
    return
  }
  func.func @transform_0(%arg0: i32, %arg1: i32) -> (i32, i32) {
    %c0_i32 = arith.constant 0 : i32
    %c0_i32_0 = arith.constant 0 : i32
    %c0_i32_1 = arith.constant 0 : i32
    return %c0_i32, %c0_i32_0 : i32, i32
  }
  func.func @transform_1(%arg0: i32, %arg1: i32) -> (i32, i32) {
    %c0_i32 = arith.constant 0 : i32
    %c0_i32_0 = arith.constant 0 : i32
    %c0_i32_1 = arith.constant 0 : i32
    return %c0_i32, %c0_i32_0 : i32, i32
  }
  func.func @transform_2(%arg0: i32, %arg1: i32) -> (i32, i32, i32, i32) {
    %c0_i32 = arith.constant 0 : i32
    %c0_i32_0 = arith.constant 0 : i32
    %c0_i32_1 = arith.constant 0 : i32
    return %arg0, %arg1, %c0_i32, %c0_i32_0 : i32, i32, i32, i32
  }
  func.func @transform_3(%arg0: i32, %arg1: i32) -> (i32, i32, i32, i32) {
    %c0_i32 = arith.constant 0 : i32
    %c0_i32_0 = arith.constant 0 : i32
    %c0_i32_1 = arith.constant 0 : i32
    return %arg0, %arg1, %c0_i32, %c0_i32_0 : i32, i32, i32, i32
  }
}

</mosaic_0001>

<bundles_post_ra>
// kernel: tpu_custom_call.1
= control target key start
LH: loop header
LB: loop body
LE: loop exit
PB: predicated region body
PF: predicated region fallthrough
CT: control target
= control target key end

     0   :  { %8 = vsyncpa [#allocation3], 0  ;;  %s1051_s0 = inlined_call_operand.vmem [shape: bf16[32,64], index: 0, kind: input, shape index: {}]   ;;  %s1052_s1 = inlined_call_operand.vmem [shape: bf16[64,32], index: 1, kind: input, shape index: {}]   ;;  %s1053_s2 = inlined_call_operand.hbm [shape: bf16[2,3,64,64], index: 2, kind: input, shape index: {}]   ;;  %s1054_s3 = inlined_call_operand.hbm [shape: f32[2,3,32,32], index: 3, kind: output, shape index: {}]  }
   0x1   :  { %10 = vsyncpa [#allocation3 + $0x1], 0 }
   0x2   :  { %11 = vsyncpa [#allocation4], 0 }
   0x3   :  { %13 = vsyncpa [#allocation4 + $0x1], 0  ;;  %s853_s12 = smov 0   ;;  %s855_s13 = smov 0  }
   0x4   :  { %s857_s14 = smov 0   ;;  %s859_s15 = smov 0  }
   0x5   :  { %s861_s16 = smov 0   ;;  %s863_s17 = smov 0  }
   0x6   :  { %s865_s18 = smov 0   ;;  %s867_s19 = smov 0  }
   0x7 LB: > { %s534_s20 = sadd.s32 4294967295, %s825_s19   ;;  %s535_s21 = sadd.s32 4294967294, %s825_s19   ;;  %s825_s19 = sphi %s867_s19, %s19_s19   ;;  %s821_s18 = sphi %s865_s18, %s1072_s18   ;;  %s817_s17 = sphi %s863_s17, %s1071_s17   ;;  %s813_s16 = sphi %s861_s16, %s1070_s16   ;;  %s809_s15 = sphi %s859_s15, %s1069_s15   ;;  %s805_s14 = sphi %s857_s14, %s1068_s14   ;;  %s801_s13 = sphi %s855_s13, %s1067_s13   ;;  %s797_s12 = sphi %s853_s12, %s1066_s12  }
   0x8   : > { %s28_s22 = sadd.s32 1, %s817_s17  ;;  %s31_s23 = sadd.s32 1, %s821_s18 }
   0x9   : > { %p29_p0 = scmp.ge.s32.totalorder %s28_s22, 3  ;;  %s82_s24 = sadd.s32 1, %s805_s14 }
   0xa   : > { %p89_p1 = scmp.ne.s32.totalorder %s805_s14, %s801_s13  ;;  %p90_p2 = scmp.eq.s32.totalorder %s825_s19, 0 }
   0xb   : > { %s1074_s22 = smov (%p29_p0, %s28_s22), 0  ;;  %s1076_s23 = smov (!%p29_p0, %s31_s23), %s821_s18 }
   0xc   : > { %1057 = sst [smem:[#allocation8_spill]] %s1074_s22  ;;  %s78_s25 = ssub.s32 %s817_s17, %s1074_s22 }
   0xd   : > { %p906_p3 = por %p90_p2, %p89_p1  ;;  %p33_p4 = scmp.ge.s32.totalorder %s1076_s23, 2 }
   0xe   : > { %p95_p5 = scmp.ne.s32.totalorder %s801_s13, %s797_s12  ;;  %p96_p6 = scmp.eq.s32.totalorder %s534_s20, 0 }
   0xf   : > { %p121_p7 = scmp.eq.s32.totalorder %s534_s20, 5  ;;  %s1078_s23 = smov (%p33_p4, %s1076_s23), 0 }
  0x10   : > { %1059 = sst [smem:[#allocation9_spill]] %s1078_s23  ;;  %p914_p8 = por %p96_p6, %p95_p5 }
  0x11   : > { %p918_p9 = por %p121_p7, %p89_p1  ;;  %s77_s29 = ssub.s32 %s821_s18, %s1078_s23 }
  0x12   : > { %p127_p10 = scmp.eq.s32.totalorder %s535_s21, 5  ;;  %s79_s30 = sor.u32 %s78_s25, %s77_s29 }
  0x13   : > { %p80_p11 = scmp.eq.s32.totalorder %s79_s30, 0  ;;  %p621_p13 = scmp.lt.s32.totalorder %s825_s19, 6 }
  0x14   : > { %p924_p12 = por %p127_p10, %p95_p5  ;;  %s153_s5 = sand.u32 1, %s805_s14  }
  0x15   : > { %s931_s6 = scalar_select %p80_p11, %s805_s14, %s82_s24  }
  0x16   : > { %s538_s7 = sshll.u32 %s153_s5, 5  ;;  %s539_s8 = sshll.u32 %s817_s17, 3 }
  0x17   : > { %s607_s9 = smul.u32 24, %s821_s18  ;;  %s157_s10 = scalar_lea.vmem [#allocation2], %s538_s7 }
  0x18   : > { %s166_s11 = sshll.u32 %s157_s10, 4  ;;  %p937_p0 = pnand %p621_p13, %p906_p3  ;;  %s167_s11 = int_to_ptr.vmem [resolvable:$true] %s166_s11 }
  0x19   : > { %s163_s21 = sadd.s32 %s607_s9, %s539_s8  ;;  %s154_s24 = scalar_lea.sflag [#allocation3], %s153_s5 }
  0x1a   : > { %s540_s25 = sshll.u32 %s163_s21, 6  ;;  %p703_p1 = pneg %p937_p0 }
  0x1b   : > { %s165_s23 = scalar_lea.hbm %s1053_s2, %s540_s25  ;;  %s714_s22 = scalar_lea.vmem %s167_s11, 512 }
  0x1c   : > { %p715_p2 = scmp.ne.s32.totalorder %s167_s11, %s714_s22  ;;  %s827_s7 = smov [#allocation2]  }
  0x1d   : > { %s719_s26 = sshll.u32 %s827_s7, 4  ;;  %s720_s26 = int_to_ptr.vmem [resolvable:$false] %s719_s26 }
  0x1e   : > { %p717_p4 = pnand %p715_p2, %p703_p1  ;;  %s721_s10 = scalar_lea.vmem %s720_s26, 1024 }
  0x1f   : > { %p722_p3 = scmp.lt.s32.totalorder %s167_s11, %s720_s26  ;;  %p723_p6 = scmp.lt.s32.totalorder %s721_s10, %s714_s22 }
  0x20   : > { %p718_p5 = pneg %p717_p4 }
  0x21   : > { %p724_p7 = por %p723_p6, %p722_p3 }
  0x23   : > { %p725_p10 = pnand %p724_p7, %p718_p5 }
  0x25   : > { %728 = shalt.err (!%p725_p10)
}
  0x26   : > { %s828_s8 = smov 64   ;;  %s829_s5 = smov 4  }
  0x27   : > { %616 = dma.hbm_to_vmem [thread:$0]  (!%p937_p0), %s165_s23, 512, %s167_s11, %s154_s24, %s828_s8, %s828_s8, %s829_s5  }
  0x28   : > { %p541_p11 = scmp.ge.s32.totalorder %s825_s19, 1  ;;  %p174_p13 = scmp.lt.s32.totalorder %s825_s19, 7 }
  0x2a   : > { %p175_p1 = pnand %p541_p11, %p174_p13 }
  0x2b   : > { %s951_s9 = sand.u32 (!%p175_p1), 1, %s801_s13  }
  0x2c   : > { %178 = sbr.rel (%p175_p1) target bundleno = 505 (0x1f9), region = 32  ;;  %s542_s22 = sshll.u32 (!%p175_p1), %s951_s9, 5 }
  0x2d   : > { %s181_s21 = scalar_lea.sflag (!%p175_p1), [#allocation3], %s951_s9  ;;  %s184_s25 = scalar_lea.vmem (!%p175_p1), [#allocation2], %s542_s22 }
  0x31   : > { %788 = dma.done.wait (%p914_p8), %s181_s21, 512  }
  0x32   : > { %790 = vsyncadd (%p914_p8), %s181_s21, 4294966784  ;;  %v691_v0 = vld [vmem:[%s1052_s1 + $0x18] sm:$0xff]   ;;  %v692_v1 = vld [vmem:[%s1052_s1 + $0x10] sm:$0xff]   ;;  %vm268_vm0 = vcmask 523264   ;;  %s608_s21 = smul.u32 12, %s813_s16  ;;  %vm423_vm1 = vcmask 261120  }
  0x33   : > { %579 = vmatprep.subr.bf16.mxu0 %v691_v0  ;;  %v693_v2 = vld [vmem:[%s1052_s1 + $0x8] sm:$0xff]   ;;  %v695_v3 = vld [vmem:[%s184_s25] sm:$0xff]   ;;  %v697_v6 = vld [vmem:[%s184_s25 + $0x10] sm:$0xff]   ;;  %s206_s11 = scalar_lea.vmem [#allocation5], %s542_s22  ;;  %s429_s30 = scalar_lea.sflag [#allocation4], %s951_s9 }
  0x34   : > { %580 = vmatpush3.bf16.msra.mxu0 %v691_v0  ;;  %587 = vmatprep.mubr.msk.bf16.mxu0 %vm268_vm0, %v695_v3  ;;  %v694_v4 = vld [vmem:[%s1052_s1] sm:$0xff]   ;;  %v696_v5 = vld [vmem:[%s184_s25 + $0x8] sm:$0xff]   ;;  %v698_v7 = vld [vmem:[%s184_s25 + $0x18] sm:$0xff]   ;;  %s561_s25 = sshll.u32 %s809_s15, 2  ;;  %s444_s20 = sshll.u32 %s206_s11, 4  ;;  %s990_s20 = int_to_ptr.vmem [resolvable:$true] %s444_s20 }
  0x35   : > { %581 = vmatprep.subr.bf16.mxu0 %v692_v1  ;;  %v699_v8 = vld [vmem:[%s1051_s0] sm:$0xff]   ;;  %v700_v21 = vld [vmem:[%s1051_s0 + $0x8] sm:$0xff]   ;;  %s441_s23 = sadd.s32 %s608_s21, %s561_s25  ;;  %s729_s24 = scalar_lea.vmem %s990_s20, 512 }
  0x36   : > { %603 = vmatprep.mubr.msk.bf16.mxu1 %vm268_vm0, %v699_v8  ;;  %s562_s29 = sshll.u32 %s441_s23, 7  ;;  %p730_p8 = scmp.ne.s32.totalorder %s990_s20, %s729_s24 }
  0x37   : > { %s996_s22 = scalar_lea.hbm %s1054_s3, %s562_s29  ;;  %s830_s27 = smov [#allocation5]  }
  0x38   : > { %582 = vmatpush3.bf16.msra.mxu0 %v692_v1  ;;  %p731_p0 = pnand %p730_p8, %p918_p9  ;;  %s733_s7 = sshll.u32 %s830_s27, 4  ;;  %s734_s7 = int_to_ptr.vmem [resolvable:$false] %s733_s7 }
  0x39   : > { %583 = vmatprep.subr.bf16.mxu0 %v693_v2  ;;  %s735_s26 = scalar_lea.vmem %s734_s7, 1024  ;;  %p736_p4 = scmp.lt.s32.totalorder %s990_s20, %s734_s7 }
  0x3a   : > { %p732_p2 = pneg %p731_p0  ;;  %p737_p5 = scmp.lt.s32.totalorder %s735_s26, %s729_s24 }
  0x3c   : > { %584 = vmatpush3.bf16.msra.mxu0 %v693_v2  ;;  %p738_p3 = por %p737_p5, %p736_p4 }
  0x3d   : > { %585 = vmatprep.subr.bf16.mxu0 %v694_v4 }
  0x3e   : > { %p739_p6 = pnand %p738_p3, %p732_p2 }
  0x40   : > { %586 = vmatpush3.bf16.msra.mxu0 %v694_v4 }
  0x43   : > { %588 = vmatmul.mubr.msk.bf16.vlgmr.msra.gmra.mxu0 %vm268_vm0, %v696_v5 }
  0x44   : > { %591 = vmatprep.mubr.msk.bf16.mxu0 %vm268_vm0, %v697_v6 }
  0x4b   : > { %592 = vmatmul.mubr.msk.bf16.gmra.mxu0 %vm268_vm0, %v698_v7 }
 0x103   : > { %v589_v9 = vpop.f32.mrf.mxu0 }
 0x105   : > { %v315_v10 = vpop.f32.mrf.mxu0 }
 0x107   : > { %v590_v11 = vpop.f32.mrf.mxu0 }
 0x108   : > { %v351_v19 = vpack.c.bf16 %v590_v11, %v589_v9 }
 0x109   : > { %v318_v12 = vpop.f32.mrf.mxu0 }
 0x10a   : > { %v350_v20 = vpack.c.bf16 %v318_v12, %v315_v10 }
 0x10b   : > { %v593_v13 = vpop.f32.mrf.mxu0 }
 0x10d   : > { %v331_v14 = vpop.f32.mrf.mxu0 }
 0x10f   : > { %v594_v15 = vpop.f32.mrf.mxu0 }
 0x110   : > { %v353_v16 = vpack.c.bf16 %v594_v15, %v593_v13 }
 0x111   : > { %v334_v17 = vpop.f32.mrf.mxu0 }
 0x112   : > { %v352_v18 = vpack.c.bf16 %v334_v17, %v331_v14  ;;  %595 = vmatprep.subr.bf16.mxu1 %v353_v16 }
 0x113   : > { %596 = vmatpush3.bf16.msra.mxu1 %v353_v16 }
 0x114   : > { %597 = vmatprep.subr.bf16.mxu1 %v352_v18 }
 0x117   : > { %598 = vmatpush3.bf16.msra.mxu1 %v352_v18 }
 0x118   : > { %599 = vmatprep.subr.bf16.mxu1 %v351_v19 }
 0x11b   : > { %600 = vmatpush3.bf16.msra.mxu1 %v351_v19 }
 0x11c   : > { %601 = vmatprep.subr.bf16.mxu1 %v350_v20 }
 0x11f   : > { %602 = vmatpush3.bf16.msra.mxu1 %v350_v20 }
 0x122   : > { %604 = vmatmul.mubr.msk.bf16.vlgmr.msra.gmra.mxu1 %vm268_vm0, %v700_v21 }
 0x1e2   : > { %v605_v22 = vpop.f32.mrf.mxu1 }
 0x1e3   : > { %v421_v23 = vmul.f32 0.020408163, %v605_v22 }
 0x1e4   : > { %v404_v24 = vpop.f32.mrf.mxu1 }
 0x1e5   : > { %426 = vst.msk [vmem:[%s206_s11 + $0x10] sm:$0xff] %vm423_vm1, %v421_v23  ;;  %v419_v25 = vmul.f32 0.020408163, %v404_v24 }
 0x1e6   : > { %v606_v26 = vpop.f32.mrf.mxu1 }
 0x1e7   : > { %424 = vst.msk [vmem:[%s206_s11] sm:$0xff] %vm423_vm1, %v419_v25  ;;  %v422_v27 = vmul.f32 0.020408163, %v606_v26 }
 0x1e8   : > { %v407_v28 = vpop.f32.mrf.mxu1 }
 0x1e9   : > { %427 = vst.msk [vmem:[%s206_s11 + $0x18] sm:$0xff] %vm423_vm1, %v422_v27  ;;  %v420_v29 = vmul.f32 0.020408163, %v407_v28 }
 0x1eb   : > { %425 = vst.msk [vmem:[%s206_s11 + $0x8] sm:$0xff] %vm423_vm1, %v420_v29 }
 0x1ec   : > { %742 = shalt.err (!%p739_p6)
}
 0x1ed   : > { %s743_s10 = scalar_lea.hbm %s996_s22, 512  ;;  %s747_s21 = scalar_lea.hbm %s1054_s3, 3072 }
 0x1ee   : > { %p744_p7 = scmp.ne.s32.totalorder %s996_s22, %s743_s10  ;;  %p748_p13 = scmp.lt.s32.totalorder %s996_s22, %s1054_s3 }
 0x1ef   : > { %p749_p1 = scmp.lt.s32.totalorder %s747_s21, %s743_s10 }
 0x1f0   : > { %p745_p10 = pnand %p744_p7, %p918_p9 }
 0x1f1   : > { %p750_p8 = por %p749_p1, %p748_p13 }
 0x1f2   : > { %p746_p11 = pneg %p745_p10 }
 0x1f4   : > { %p751_p0 = pnand %p750_p8, %p746_p11 }
 0x1f6   : > { %754 = shalt.err (!%p751_p0)
}
 0x1f7   : > { %s831_s11 = smov 128   ;;  %s832_s29 = smov 8  }
 0x1f8   : > { %611 = dma.vmem_to_hbm [thread:$0]  (%p918_p9), %s990_s20, 512, %s996_s22, %s429_s30, %s831_s11, %s831_s11, %s832_s29  }
 0x1f9 PF: > { %p622_p2 = scmp.ge.s32.totalorder %s825_s19, 2  ;;  %s459_s15 = sand.u32 1, %s797_s12  }
 0x1fa   : > { %s460_s16 = scalar_lea.sflag [#allocation4], %s459_s15 }
 0x1fb   : > { %p618_p4 = pnand %p622_p2, %p924_p12 }
 0x1fd   : > { %p619_p5 = pneg %p618_p4 }
 0x1ff   : > { %792 = dma.done.wait (%p619_p5), %s460_s16, 512  }
 0x200   : > { %794 = vsyncadd (%p619_p5), %s460_s16, 4294966784  ;;  %s19_s19 = sadd.s32 1, %s825_s19   ;;  %s1064_s28 = sld [smem:[#allocation8_spill]] }
 0x201   : > { %p16_p3 = scmp.ge.s32.totalorder %s19_s19, 8   ;;  %s1065_s9 = sld [smem:[#allocation9_spill]] }
 0x202   : > { %s1066_s12 = smov %s801_s13  ;;  %s1067_s13 = smov %s805_s14 }
 0x203   : > { %s1068_s14 = smov %s931_s6  ;;  %s1069_s15 = smov %s817_s17 }
 0x204   : > { %s1070_s16 = smov %s821_s18  ;;  %18 = sbr.rel (!%p16_p3) target bundleno = 7 (0x7), region = 77 }
 0x206   : > { %s1071_s17 = smov %s1064_s28 }
 0x207   : > { %s1072_s18 = smov %s1065_s9 }
 0x209   :  { %465 = vsyncpa [#allocation3], 1 }
 0x20a   :  { %467 = vsyncpa [#allocation3 + $0x1], 1 }
 0x20b   :  { %468 = vsyncpa [#allocation4], 1 }
 0x20c   :  { %470 = vsyncpa [#allocation4 + $0x1], 1 }

</bundles_post_ra>
